<compile_context>
chip_gen: v6e
topology: v6e:2x2x1
jax: 0.10.0
libtpu: 0.0.40
codegen_flags: <defaults>
</compile_context>

<pallas_src>
import jax
import jax.numpy as jnp
from jax.experimental import pallas as pl
from jax.experimental.pallas import tpu as pltpu


def _qdq_kernel(inv_s_ref, s_ref, zp_ref, x_ref, o_ref, *, qmin, qmax):
    x = x_ref[...]                 # (row_blk, HW)  float32
    inv_s = inv_s_ref[...]         # (row_blk, 1)   float32, broadcasts over lanes
    s = s_ref[...]                 # (row_blk, 1)
    zp = zp_ref[...]               # (row_blk, 1)   float32
    q = jnp.clip(jnp.round(x * inv_s) + zp, qmin, qmax)   # round half-to-even
    o_ref[...] = (q - zp) * s                             # dequantize


def _choose_row_block(nc, hw, target_bytes=2 * 1024 * 1024):
    """Rows per block: a multiple of 8 that evenly divides nc, sized ~target_bytes.

    Falls back to the full row extent (always legal for BlockSpec) if no
    suitable divisor exists.
    """
    bytes_per_row = hw * 4
    max_rows = max(1, target_bytes // bytes_per_row)
    r = (min(nc, max_rows) // 8) * 8
    while r >= 8:
        if nc % r == 0:
            return r
        r -= 8
    return nc


def quantize_dequantize_per_channel(x, scales, zero_points, axis=1, qdtype="qint8"):
    """x: float32 NCHW; scales/zero_points: per-channel along `axis` (must be 1)."""
    assert axis == 1, "kernel is written for channel axis = 1 (NCHW layout)"
    if qdtype == "qint8":
        qmin, qmax = -128.0, 127.0
    elif qdtype == "quint8":
        qmin, qmax = 0.0, 255.0
    elif qdtype == "qint32":
        # TODO(synk): f32 clipping cannot exactly represent 2**31 - 1; qint32
        # saturation / precision differs from torch for very large magnitudes.
        qmin, qmax = -(2.0 ** 31), 2.0 ** 31 - 1.0
    else:
        raise ValueError(qdtype)

    N, C, H, W = x.shape
    NC, HW = N * C, H * W

    scales = jnp.asarray(scales, jnp.float32)
    zps = jnp.asarray(zero_points, jnp.int32).astype(jnp.float32)

    # Per-row (row = n*C + c) parameter vectors for the flattened (N*C, H*W) view.
    s_rows = jnp.tile(scales, N).reshape(NC, 1)
    inv_rows = (1.0 / jnp.tile(scales, N)).reshape(NC, 1)
    zp_rows = jnp.tile(zps, N).reshape(NC, 1)

    x2 = x.reshape(NC, HW)

    row_blk = _choose_row_block(NC, HW)
    grid = (NC // row_blk,) if NC % row_blk == 0 else (1,)
    if NC % row_blk != 0:
        row_blk = NC  # full extent fallback

    kernel = lambda i, s, z, xi, oi: _qdq_kernel(i, s, z, xi, oi, qmin=qmin, qmax=qmax)

    param_spec = pl.BlockSpec((row_blk, 1), lambda i: (i, 0))
    data_spec = pl.BlockSpec((row_blk, HW), lambda i: (i, 0))

    out2 = pl.pallas_call(
        kernel,
        out_shape=jax.ShapeDtypeStruct((NC, HW), jnp.float32),
        grid=grid,
        in_specs=[param_spec, param_spec, param_spec, data_spec],
        out_specs=data_spec,
        compiler_params=pltpu.CompilerParams(
            dimension_semantics=("parallel",),
        ),
    )(inv_rows, s_rows, zp_rows, x2)

    return out2.reshape(N, C, H, W)


def _reference(x, scales, zero_points, qmin, qmax):
    # Pure-JAX reference (true division), matching torch semantics for int8 paths.
    s = scales.reshape(1, -1, 1, 1)
    z = zero_points.astype(jnp.float32).reshape(1, -1, 1, 1)
    q = jnp.clip(jnp.round(x / s) + z, qmin, qmax)
    return (q - z) * s


if __name__ == "__main__":
    key = jax.random.PRNGKey(0)
    N, C, H, W = 2, 4, 16, 16
    x = jax.random.normal(key, (N, C, H, W), dtype=jnp.float32) * 3.0

    # Deterministic per-channel quantization params (axis=1, dtype=qint8).
    # Power-of-two scales => multiply-by-reciprocal is bit-exact vs division.
    scales = jnp.array([0.5, 0.25, 1.0, 0.125], dtype=jnp.float32)
    zero_points = jnp.array([0, 1, -2, 3], dtype=jnp.int32)

    out = quantize_dequantize_per_channel(x, scales, zero_points, axis=1, qdtype="qint8")
    out = jax.block_until_ready(out)

    ref = _reference(x, scales, zero_points, -128.0, 127.0)
    assert out.shape == (N, C, H, W)
    assert jnp.allclose(out, ref, atol=1e-6), "mismatch vs reference"

    print("KERNEL_OK")
</pallas_src>

<mosaic_0001>
module attributes {stable_mosaic.version = 11 : i64} {
  func.func @_lambda_(%arg0: i32, %arg1: memref<8x1xf32, #tpu.memory_space<vmem>>, %arg2: memref<8x1xf32, #tpu.memory_space<vmem>>, %arg3: memref<8x1xf32, #tpu.memory_space<vmem>>, %arg4: memref<8x256xf32, #tpu.memory_space<vmem>>, %arg5: memref<8x256xf32, #tpu.memory_space<vmem>>) attributes {dimension_semantics = [#tpu.dimension_semantics<parallel>], iteration_bounds = array<i64: 1>, scalar_prefetch = 0 : i64, scratch_operands = 0 : i64, tpu.core_type = #tpu.core_type<tc>, window_params = [{transform_indices = @transform_0, window_bounds = array<i64: 8, 1>}, {transform_indices = @transform_1, window_bounds = array<i64: 8, 1>}, {transform_indices = @transform_2, window_bounds = array<i64: 8, 1>}, {transform_indices = @transform_3, window_bounds = array<i64: 8, 256>}, {transform_indices = @transform_4, window_bounds = array<i64: 8, 256>}]} {
    %c0 = arith.constant 0 : index
    %c0_0 = arith.constant 0 : index
    %0 = vector.load %arg4[%c0, %c0_0] : memref<8x256xf32, #tpu.memory_space<vmem>>, vector<8x256xf32>
    %c0_1 = arith.constant 0 : index
    %c0_2 = arith.constant 0 : index
    %1 = vector.load %arg1[%c0_1, %c0_2] : memref<8x1xf32, #tpu.memory_space<vmem>>, vector<8x1xf32>
    %c0_3 = arith.constant 0 : index
    %c0_4 = arith.constant 0 : index
    %2 = vector.load %arg2[%c0_3, %c0_4] : memref<8x1xf32, #tpu.memory_space<vmem>>, vector<8x1xf32>
    %c0_5 = arith.constant 0 : index
    %c0_6 = arith.constant 0 : index
    %3 = vector.load %arg3[%c0_5, %c0_6] : memref<8x1xf32, #tpu.memory_space<vmem>>, vector<8x1xf32>
    %4 = vector.broadcast %1 : vector<8x1xf32> to vector<8x256xf32>
    %5 = arith.mulf %0, %4 : vector<8x256xf32>
    %6 = math.roundeven %5 : vector<8x256xf32>
    %7 = vector.broadcast %3 : vector<8x1xf32> to vector<8x256xf32>
    %8 = arith.addf %6, %7 : vector<8x256xf32>
    %cst = arith.constant -1.280000e+02 : f32
    %cst_7 = arith.constant 1.270000e+02 : f32
    %9 = vector.broadcast %cst : f32 to vector<8x256xf32>
    %10 = arith.maximumf %9, %8 : vector<8x256xf32>
    %11 = vector.broadcast %cst_7 : f32 to vector<8x256xf32>
    %12 = arith.minimumf %11, %10 : vector<8x256xf32>
    %13 = vector.broadcast %3 : vector<8x1xf32> to vector<8x256xf32>
    %14 = arith.subf %12, %13 : vector<8x256xf32>
    %15 = vector.broadcast %2 : vector<8x1xf32> to vector<8x256xf32>
    %16 = arith.mulf %14, %15 : vector<8x256xf32>
    %c0_8 = arith.constant 0 : index
    %c0_9 = arith.constant 0 : index
    %17 = vector.load %arg5[%c0_8, %c0_9] : memref<8x256xf32, #tpu.memory_space<vmem>>, vector<8x256xf32>
    tpu.vector_store %arg5[%c0_8, %c0_9], %16 {strides = array<i32>} : memref<8x256xf32, #tpu.memory_space<vmem>>, vector<8x256xf32>,
    return
  }
  func.func @transform_0(%arg0: i32) -> (i32, i32) {
    %c0_i32 = arith.constant 0 : i32
    %c0_i32_0 = arith.constant 0 : i32
    return %arg0, %c0_i32 : i32, i32
  }
  func.func @transform_1(%arg0: i32) -> (i32, i32) {
    %c0_i32 = arith.constant 0 : i32
    %c0_i32_0 = arith.constant 0 : i32
    return %arg0, %c0_i32 : i32, i32
  }
  func.func @transform_2(%arg0: i32) -> (i32, i32) {
    %c0_i32 = arith.constant 0 : i32
    %c0_i32_0 = arith.constant 0 : i32
    return %arg0, %c0_i32 : i32, i32
  }
  func.func @transform_3(%arg0: i32) -> (i32, i32) {
    %c0_i32 = arith.constant 0 : i32
    %c0_i32_0 = arith.constant 0 : i32
    return %arg0, %c0_i32 : i32, i32
  }
  func.func @transform_4(%arg0: i32) -> (i32, i32) {
    %c0_i32 = arith.constant 0 : i32
    %c0_i32_0 = arith.constant 0 : i32
    return %arg0, %c0_i32 : i32, i32
  }
}

</mosaic_0001>

<bundles_post_ra>
// kernel: tpu_custom_call.1
= control target key start
LH: loop header
LB: loop body
LE: loop exit
PB: predicated region body
PF: predicated region fallthrough
CT: control target
= control target key end

     0   :  { %v110_v2 = vmov 0   ;;  %s155_s0 = inlined_call_operand.vmem [shape: f32[8,1], index: 0, kind: input, shape index: {}]   ;;  %s156_s1 = inlined_call_operand.vmem [shape: f32[8,1], index: 1, kind: input, shape index: {}]   ;;  %s157_s2 = inlined_call_operand.vmem [shape: f32[8,1], index: 2, kind: input, shape index: {}]   ;;  %s158_s3 = inlined_call_operand.vmem [shape: f32[8,256], index: 3, kind: input, shape index: {}]   ;;  %s159_s4 = inlined_call_operand.hbm [shape: f32[8,256], index: 4, kind: output, shape index: {}]  }
   0x1   :  { %v20_v0 = vld [vmem:[%s155_s0] sm:$0xff]  ;;  %86 = vset.pattern.permute.xlu0 %v110_v2  ;;  %87 = vset.pattern.permute.xlu1 %v110_v2 }
   0x2   :  { %v21_v1 = vld [vmem:[%s156_s1] sm:$0xff] }
   0x3   :  { %9 = vsyncpa [#allocation3], 0  ;;  %25 = vperm.xlu0 %86, %v20_v0   ;;  %47 = vperm.xlu1 %87, %v21_v1   ;;  %v22_v3 = vld [vmem:[%s157_s2] sm:$0xff]  ;;  %v19_v5 = vld [vmem:[%s158_s3 + $0x8] sm:$0xff]  ;;  %s111_s1 = smov [#allocation2]  }
   0x4   :  { %v18_v4 = vld [vmem:[%s158_s3] sm:$0xff]  ;;  %s60_s2 = sshll.u32 %s111_s1, 4  ;;  %s61_s2 = int_to_ptr.vmem [resolvable:$true] %s60_s2 }
   0x5   :  { %s88_s3 = scalar_lea.vmem %s61_s2, 256  ;;  %p93_p1 = scmp.lt.s32.totalorder %s61_s2, %s61_s2 }
   0x6   :  { %p89_p0 = scmp.ne.s32.totalorder %s61_s2, %s88_s3  ;;  %p94_p2 = scmp.lt.s32.totalorder %s88_s3, %s88_s3 }
   0x7   :  { %34 = vperm.xlu0 %86, %v22_v3  }
   0x8   :  { %p95_p3 = por %p94_p2, %p93_p1 }
   0xa   :  { %p96_p4 = pnand %p95_p3, %p89_p0 }
  0x7e   :  { %v26_v6 = vpop.permute.xlu0 %25  ;;  %v48_v30 = vpop.permute.xlu1 %47 }
  0x7f   :  { %v28_v7 = vmul.f32 %v26_v6, %v18_v4  ;;  %v29_v8 = vmul.f32 %v26_v6, %v19_v5 }
  0x81   :  { %v70_v9 = vcvt.f32.s32 %v28_v7  ;;  %v78_v10 = vcvt.f32.s32 %v29_v8  ;;  %v68_v13 = vand.u32 2147483647, %v28_v7  ;;  %v76_v14 = vand.u32 2147483647, %v29_v8 }
  0x82   :  { %v73_v16 = vand.u32 2147483648, %v28_v7  ;;  %v81_v18 = vand.u32 2147483648, %v29_v8  ;;  %v35_v21 = vpop.permute.xlu0 %34 }
  0x83   :  { %v71_v11 = vcvt.s32.f32 %v70_v9  ;;  %v79_v12 = vcvt.s32.f32 %v78_v10  ;;  %vm69_vm0 = vcmp.lt.f32.partialorder %v68_v13, 8388608.0  ;;  %vm77_vm1 = vcmp.lt.f32.partialorder %v76_v14, 8388608.0 }
  0x85   :  { %v72_v15 = vand.u32 2147483647, %v71_v11  ;;  %v80_v17 = vand.u32 2147483647, %v79_v12 }
  0x87   :  { %v74_v19 = vor.u32 %v73_v16, %v72_v15  ;;  %v82_v20 = vor.u32 %v81_v18, %v80_v17 }
  0x89   :  { %v75_v22 = vsel %vm69_vm0, %v74_v19, %v28_v7  ;;  %v83_v23 = vsel %vm77_vm1, %v82_v20, %v29_v8 }
  0x8a   :  { %v37_v24 = vadd.f32 %v75_v22, %v35_v21  ;;  %v38_v25 = vadd.f32 %v83_v23, %v35_v21 }
  0x8c   :  { %v39_v26 = vmax.f32 %v37_v24, -128.0  ;;  %v40_v27 = vmax.f32 %v38_v25, -128.0 }
  0x8e   :  { %v41_v28 = vmin.f32 %v39_v26, 127.0  ;;  %v42_v29 = vmin.f32 %v40_v27, 127.0 }
  0x90   :  { %v43_v31 = vsub.f32 %v41_v28, %v35_v21  ;;  %v44_v32 = vsub.f32 %v42_v29, %v35_v21 }
  0x92   :  { %v50_v33 = vmul.f32 %v48_v30, %v43_v31  ;;  %v51_v34 = vmul.f32 %v48_v30, %v44_v32 }
  0x94   :  { %52 = vst [vmem:[#allocation2] sm:$0xff] %v50_v33  ;;  %53 = vst [vmem:[#allocation2 + $0x8] sm:$0xff] %v51_v34 }
  0x95   :  { %99 = shalt.err (!%p96_p4)
}
  0x96   :  { %63 = dma.vmem_to_hbm [thread:$0]  %s61_s2, 256, %s159_s4, [#allocation3]  }
  0x97   :  { %108 = dma.done.wait [#allocation3], 256  }
  0x98   :  { %109 = vsyncadd [#allocation3], 4294967040 }
  0x99   :  { %67 = vsyncpa [#allocation3], 1 }

</bundles_post_ra>
